<compile_context>
chip_gen: v6e
topology: v6e:2x2x1
jax: 0.10.0
libtpu: 0.0.40
codegen_flags: <defaults>
</compile_context>

<pallas_src>
import functools

import jax
import jax.numpy as jnp
from jax.experimental import pallas as pl
from jax.experimental.pallas import tpu as pltpu

ROW_TILE = 128          # rows of the flattened [B*S, H] per grid step (max)
LANE = 128              # TPU lane width: classifier output padded to this
LN_EPS = 1e-12
VMEM_LIMIT = 64 * 1024 * 1024   # safe on v5e/v6e (128 MiB) and v7x (64 MiB)


def _round_up(x, m):
    return ((x + m - 1) // m) * m


def _pick_row_tile(n):
    # bf16 sublane packing is 16, so round small-N tiles to a multiple of 16.
    return ROW_TILE if n >= ROW_TILE else _round_up(n, 16)


def _pad_rows(x, rows):
    n = x.shape[0]
    if rows == n:
        return x
    return jnp.pad(x, ((0, rows - n), (0, 0)))


# ----------------------------- Pallas kernels -----------------------------

def _linear_kernel(x_ref, w_ref, b_ref, o_ref):
    y = jnp.dot(x_ref[...], w_ref[...], preferred_element_type=jnp.float32)
    o_ref[...] = (y + b_ref[...]).astype(o_ref.dtype)


def linear(x, w, b, out_dtype=None):
    """x: (N, H) bf16, w: (H, O) bf16, b: (1, O) f32 -> (N, O)."""
    n, h = x.shape
    o = w.shape[1]
    out_dtype = out_dtype or x.dtype
    tile = _pick_row_tile(n)
    np_ = _round_up(n, tile)
    xp = _pad_rows(x, np_)
    out = pl.pallas_call(
        _linear_kernel,
        out_shape=jax.ShapeDtypeStruct((np_, o), out_dtype),
        grid=(np_ // tile,),
        in_specs=[
            pl.BlockSpec((tile, h), lambda i: (i, 0)),
            pl.BlockSpec((h, o), lambda i: (0, 0)),
            pl.BlockSpec((1, o), lambda i: (0, 0)),
        ],
        out_specs=pl.BlockSpec((tile, o), lambda i: (i, 0)),
        compiler_params=pltpu.CompilerParams(
            dimension_semantics=("parallel",), vmem_limit_bytes=VMEM_LIMIT),
    )(xp, w, b)
    return out[:n] if np_ != n else out


def _ln_kernel(x_ref, g_ref, b_ref, o_ref, *, eps):
    x = x_ref[...].astype(jnp.float32)
    mu = jnp.mean(x, axis=-1, keepdims=True)
    var = jnp.mean(jnp.square(x - mu), axis=-1, keepdims=True)
    y = (x - mu) * jax.lax.rsqrt(var + eps)
    o_ref[...] = (y * g_ref[...] + b_ref[...]).astype(o_ref.dtype)


def layer_norm(x, gamma, beta, eps=LN_EPS, out_dtype=None):
    """Plain LayerNorm (no residual) over the hidden axis."""
    n, h = x.shape
    out_dtype = out_dtype or x.dtype
    tile = _pick_row_tile(n)
    np_ = _round_up(n, tile)
    xp = _pad_rows(x, np_)
    out = pl.pallas_call(
        functools.partial(_ln_kernel, eps=eps),
        out_shape=jax.ShapeDtypeStruct((np_, h), out_dtype),
        grid=(np_ // tile,),
        in_specs=[
            pl.BlockSpec((tile, h), lambda i: (i, 0)),
            pl.BlockSpec((1, h), lambda i: (0, 0)),
            pl.BlockSpec((1, h), lambda i: (0, 0)),
        ],
        out_specs=pl.BlockSpec((tile, h), lambda i: (i, 0)),
        compiler_params=pltpu.CompilerParams(
            dimension_semantics=("parallel",), vmem_limit_bytes=VMEM_LIMIT),
    )(xp, gamma, beta)
    return out[:n] if np_ != n else out


def _matmul_res_ln_kernel(x_ref, w_ref, b_ref, r_ref, g_ref, bb_ref, o_ref, *, eps):
    # y = LN(x @ w + b + residual) * gamma + beta, all in one tile.
    y = jnp.dot(x_ref[...], w_ref[...], preferred_element_type=jnp.float32)
    y = y + b_ref[...] + r_ref[...].astype(jnp.float32)
    mu = jnp.mean(y, axis=-1, keepdims=True)
    var = jnp.mean(jnp.square(y - mu), axis=-1, keepdims=True)
    yn = (y - mu) * jax.lax.rsqrt(var + eps)
    o_ref[...] = (yn * g_ref[...] + bb_ref[...]).astype(o_ref.dtype)


def matmul_residual_ln(x, w, b, res, gamma, beta, eps=LN_EPS, out_dtype=None):
    n, h = x.shape
    o = w.shape[1]
    out_dtype = out_dtype or x.dtype
    tile = _pick_row_tile(n)
    np_ = _round_up(n, tile)
    xp = _pad_rows(x, np_)
    rp = _pad_rows(res, np_)
    out = pl.pallas_call(
        functools.partial(_matmul_res_ln_kernel, eps=eps),
        out_shape=jax.ShapeDtypeStruct((np_, o), out_dtype),
        grid=(np_ // tile,),
        in_specs=[
            pl.BlockSpec((tile, h), lambda i: (i, 0)),
            pl.BlockSpec((h, o), lambda i: (0, 0)),
            pl.BlockSpec((1, o), lambda i: (0, 0)),
            pl.BlockSpec((tile, o), lambda i: (i, 0)),
            pl.BlockSpec((1, o), lambda i: (0, 0)),
            pl.BlockSpec((1, o), lambda i: (0, 0)),
        ],
        out_specs=pl.BlockSpec((tile, o), lambda i: (i, 0)),
        compiler_params=pltpu.CompilerParams(
            dimension_semantics=("parallel",), vmem_limit_bytes=VMEM_LIMIT),
    )(xp, w, b, rp, gamma, beta)
    return out[:n] if np_ != n else out


def _ffn_ln_cls_kernel(x_ref, w1_ref, b1_ref, w2_ref, b2_ref,
                       g_ref, bb_ref, wc_ref, bc_ref, logit_ref, *, eps):
    # unpooled = LN(gelu(x@w1+b1)@w2 + b2 + x); logits = unpooled @ w_cls + b_cls
    # The (tile, I) intermediate and the unpooled tile stay in VMEM (never HBM).
    x = x_ref[...]
    h = jnp.dot(x, w1_ref[...], preferred_element_type=jnp.float32) + b1_ref[...]
    h = jax.nn.gelu(h)  # TODO(synk): tanh-approx GELU; HF RoBERTa uses exact erf form.
    y = jnp.dot(h.astype(w2_ref.dtype), w2_ref[...],
                preferred_element_type=jnp.float32)
    y = y + b2_ref[...] + x.astype(jnp.float32)
    mu = jnp.mean(y, axis=-1, keepdims=True)
    var = jnp.mean(jnp.square(y - mu), axis=-1, keepdims=True)
    yn = (y - mu) * jax.lax.rsqrt(var + eps)
    unpooled = yn * g_ref[...] + bb_ref[...]
    logits = jnp.dot(unpooled.astype(wc_ref.dtype), wc_ref[...],
                     preferred_element_type=jnp.float32) + bc_ref[...]
    logit_ref[...] = logits.astype(logit_ref.dtype)


def ffn_ln_classifier(x, w1, b1, w2, b2, gamma, beta, wc, bc, eps=LN_EPS):
    # TODO(synk): at real sizes on v7x (64 MiB VMEM) tile w1/w2 along the I axis.
    n, h = x.shape
    i_dim = w1.shape[1]
    c = wc.shape[1]
    tile = _pick_row_tile(n)
    np_ = _round_up(n, tile)
    xp = _pad_rows(x, np_)
    out = pl.pallas_call(
        functools.partial(_ffn_ln_cls_kernel, eps=eps),
        out_shape=jax.ShapeDtypeStruct((np_, c), jnp.float32),
        grid=(np_ // tile,),
        in_specs=[
            pl.BlockSpec((tile, h), lambda i: (i, 0)),
            pl.BlockSpec((h, i_dim), lambda i: (0, 0)),
            pl.BlockSpec((1, i_dim), lambda i: (0, 0)),
            pl.BlockSpec((i_dim, h), lambda i: (0, 0)),
            pl.BlockSpec((1, h), lambda i: (0, 0)),
            pl.BlockSpec((1, h), lambda i: (0, 0)),
            pl.BlockSpec((1, h), lambda i: (0, 0)),
            pl.BlockSpec((h, c), lambda i: (0, 0)),
            pl.BlockSpec((1, c), lambda i: (0, 0)),
        ],
        out_specs=pl.BlockSpec((tile, c), lambda i: (i, 0)),
        compiler_params=pltpu.CompilerParams(
            dimension_semantics=("parallel",), vmem_limit_bytes=VMEM_LIMIT),
    )(xp, w1, b1, w2, b2, gamma, beta, wc, bc)
    return out[:n] if np_ != n else out


def _attention_kernel(q_ref, k_ref, v_ref, m_ref, o_ref, *, scale):
    q = q_ref[0]                                  # (nH, S, dh) bf16
    k = k_ref[0]
    v = v_ref[0]
    s = jnp.einsum("hqd,hkd->hqk", q, k,
                   preferred_element_type=jnp.float32) * scale
    mask = m_ref[0] > 0.0                         # (1, 1, S) -> broadcast over heads/queries
    s = jnp.where(mask, s, -1e9)
    s = s - jnp.max(s, axis=-1, keepdims=True)
    p = jnp.exp(s)
    inv = pl.reciprocal(jnp.sum(p, axis=-1, keepdims=True), approx=True)
    p = p * inv
    o = jnp.einsum("hqk,hkd->hqd", p.astype(v.dtype), v,
                   preferred_element_type=jnp.float32)
    o_ref[0] = o.astype(o_ref.dtype)


def attention(q, k, v, mask):
    """q,k,v: (B, nH, S, dh) bf16; mask: (B, 1, 1, S) f32 -> (B, nH, S, dh)."""
    B, nH, S, dh = q.shape
    scale = 1.0 / (dh ** 0.5)
    qkv_spec = pl.BlockSpec((1, nH, S, dh), lambda b: (b, 0, 0, 0))
    return pl.pallas_call(
        functools.partial(_attention_kernel, scale=scale),
        out_shape=jax.ShapeDtypeStruct((B, nH, S, dh), q.dtype),
        grid=(B,),
        in_specs=[
            qkv_spec, qkv_spec, qkv_spec,
            pl.BlockSpec((1, 1, 1, S), lambda b: (b, 0, 0, 0)),
        ],
        out_specs=qkv_spec,
        compiler_params=pltpu.CompilerParams(
            dimension_semantics=("parallel",), vmem_limit_bytes=VMEM_LIMIT),
    )(q, k, v, mask)


# ------------------------------ model wrapper ------------------------------

def init_params(key, vocab, type_vocab, max_pos, H, nH, I, num_labels):
    ks = jax.random.split(key, 10)

    def n(k, shape, dtype=jnp.bfloat16):
        return (jax.random.normal(k, shape, jnp.float32) * 0.02).astype(dtype)

    zeros = lambda shape: jnp.zeros(shape, jnp.float32)
    ones = lambda shape: jnp.ones(shape, jnp.float32)

    num_labels_pad = _round_up(num_labels, LANE)
    w_cls = jax.random.normal(ks[9], (H, num_labels), jnp.float32) * 0.02
    w_cls_pad = (jnp.zeros((H, num_labels_pad), jnp.float32)
                 .at[:, :num_labels].set(w_cls).astype(jnp.bfloat16))

    return {
        "word_emb": n(ks[0], (vocab, H), jnp.float32),
        "pos_emb": n(ks[1], (max_pos, H), jnp.float32),
        "type_emb": n(ks[2], (type_vocab, H), jnp.float32),
        "emb_ln_g": ones((1, H)), "emb_ln_b": zeros((1, H)),
        # fused QKV projection weight (H, 3H)
        "wqkv": jnp.concatenate(
            [n(ks[3], (H, H)), n(ks[4], (H, H)), n(ks[5], (H, H))], axis=1),
        "bqkv": zeros((1, 3 * H)),
        "wo": n(ks[6], (H, H)), "bo": zeros((1, H)),
        "attn_ln_g": ones((1, H)), "attn_ln_b": zeros((1, H)),
        "w_ff1": n(ks[7], (H, I)), "b_ff1": zeros((1, I)),
        "w_ff2": n(ks[8], (I, H)), "b_ff2": zeros((1, H)),
        "ffn_ln_g": ones((1, H)), "ffn_ln_b": zeros((1, H)),
        "w_cls": w_cls_pad, "b_cls": zeros((1, num_labels_pad)),
        "num_labels": num_labels,
        "num_heads": nH,
    }


def token_classification_forward(params, input_ids, segment_ids, input_mask,
                                 label_ids=None, label_mask=None,
                                 compute_loss=False):
    B, S = input_ids.shape
    H = params["word_emb"].shape[1]
    nH = params["num_heads"]
    dh = H // nH
    N = B * S
    num_labels = params["num_labels"]

    # ---- encoder.encode(...): embeddings (gathers = XLA glue) + Pallas LN ----
    positions = jnp.arange(S, dtype=jnp.int32)
    emb = (jnp.take(params["word_emb"], input_ids, axis=0)
           + jnp.take(params["pos_emb"], positions, axis=0)[None, :, :]
           + jnp.take(params["type_emb"], segment_ids, axis=0))
    x = layer_norm(emb.reshape(N, H), params["emb_ln_g"], params["emb_ln_b"],
                   out_dtype=jnp.bfloat16)

    # ---- self-attention block: fused QKV projection, heads batched per grid step ----
    qkv = linear(x, params["wqkv"], params["bqkv"])            # (N, 3H) bf16
    q, k, v = qkv[:, :H], qkv[:, H:2 * H], qkv[:, 2 * H:]

    def split_heads(t):  # (N, H) -> (B, nH, S, dh); relayout kept in XLA glue
        return t.reshape(B, S, nH, dh).transpose(0, 2, 1, 3)

    mask_b = input_mask.astype(jnp.float32).reshape(B, 1, 1, S)
    ctx = attention(split_heads(q), split_heads(k), split_heads(v), mask_b)
    ctx = ctx.transpose(0, 2, 1, 3).reshape(N, H)

    # output projection + residual add + attn LayerNorm fused in one kernel
    x = matmul_residual_ln(ctx, params["wo"], params["bo"], x,
                           params["attn_ln_g"], params["attn_ln_b"],
                           out_dtype=jnp.bfloat16)

    # ---- FFN + residual + LN + classifier head (dropout = identity in eval) ----
    logits_padded = ffn_ln_classifier(
        x, params["w_ff1"], params["b_ff1"], params["w_ff2"], params["b_ff2"],
        params["ffn_ln_g"], params["ffn_ln_b"], params["w_cls"], params["b_cls"])
    logits = logits_padded[:, :num_labels].reshape(B, S, num_labels)

    if not compute_loss:
        return logits

    # masked CrossEntropyLoss over label_mask == 1 positions (scalar glue)
    lf = logits.reshape(-1, num_labels)
    labels = label_ids.reshape(-1)
    active = (label_mask.reshape(-1) == 1).astype(jnp.float32)
    logp = jax.nn.log_softmax(lf, axis=-1)
    nll = -jnp.take_along_axis(logp, labels[:, None], axis=-1)[:, 0]
    loss = jnp.sum(nll * active) / jnp.maximum(jnp.sum(active), 1.0)
    return logits, loss
    # TODO(synk): encoder_output.other (per-layer hidden states) is not returned.


# ---------------------------------- main ----------------------------------

if __name__ == "__main__":
    B, S, H, nH, I = 2, 8, 32, 4, 64
    VOCAB, TYPE_VOCAB, MAX_POS, NUM_LABELS = 50, 2, 16, 5

    key = jax.random.PRNGKey(0)
    k_param, k_ids, k_lab = jax.random.split(key, 3)

    params = init_params(k_param, VOCAB, TYPE_VOCAB, MAX_POS, H, nH, I, NUM_LABELS)

    input_ids = jax.random.randint(k_ids, (B, S), 1, VOCAB, dtype=jnp.int32)
    segment_ids = jnp.zeros((B, S), dtype=jnp.int32)
    # last two tokens of the second example are padding
    input_mask = jnp.array([[1] * S, [1] * (S - 2) + [0, 0]], dtype=jnp.int32)
    label_ids = jax.random.randint(k_lab, (B, S), 0, NUM_LABELS, dtype=jnp.int32)
    label_mask = input_mask

    logits, loss = token_classification_forward(
        params, input_ids, segment_ids, input_mask,
        label_ids=label_ids, label_mask=label_mask, compute_loss=True)

    jax.block_until_ready((logits, loss))
    assert logits.shape == (B, S, NUM_LABELS)
    assert loss.shape == ()
    print("KERNEL_OK")
</pallas_src>

<mosaic_0001>
module attributes {stable_mosaic.version = 11 : i64} {
  func.func @_ln_kernel(%arg0: i32, %arg1: memref<16x32xf32, #tpu.memory_space<vmem>>, %arg2: memref<1x32xf32, #tpu.memory_space<vmem>>, %arg3: memref<1x32xf32, #tpu.memory_space<vmem>>, %arg4: memref<16x32xbf16, #tpu.memory_space<vmem>>) attributes {dimension_semantics = [#tpu.dimension_semantics<parallel>], iteration_bounds = array<i64: 1>, scalar_prefetch = 0 : i64, scratch_operands = 0 : i64, tpu.core_type = #tpu.core_type<tc>, window_params = [{transform_indices = @transform_0, window_bounds = array<i64: 16, 32>}, {pipeline_mode = #tpu.pipeline_mode<synchronous>, transform_indices = @transform_1, window_bounds = array<i64: 1, 32>}, {pipeline_mode = #tpu.pipeline_mode<synchronous>, transform_indices = @transform_2, window_bounds = array<i64: 1, 32>}, {transform_indices = @transform_3, window_bounds = array<i64: 16, 32>}]} {
    %c0 = arith.constant 0 : index
    %c0_0 = arith.constant 0 : index
    %0 = vector.load %arg1[%c0, %c0_0] : memref<16x32xf32, #tpu.memory_space<vmem>>, vector<16x32xf32>
    %cst = arith.constant dense<0.000000e+00> : vector<16xf32>
    %1 = vector.multi_reduction <add>, %0, %cst [1] : vector<16x32xf32> to vector<16xf32>
    %2 = vector.shape_cast %1 : vector<16xf32> to vector<16x1xf32>
    %cst_1 = arith.constant 3.200000e+01 : f32
    %3 = vector.broadcast %cst_1 : f32 to vector<16x1xf32>
    %4 = arith.divf %2, %3 : vector<16x1xf32>
    %5 = vector.broadcast %4 : vector<16x1xf32> to vector<16x32xf32>
    %6 = arith.subf %0, %5 : vector<16x32xf32>
    %7 = arith.mulf %6, %6 : vector<16x32xf32>
    %cst_2 = arith.constant dense<0.000000e+00> : vector<16xf32>
    %8 = vector.multi_reduction <add>, %7, %cst_2 [1] : vector<16x32xf32> to vector<16xf32>
    %9 = vector.shape_cast %8 : vector<16xf32> to vector<16x1xf32>
    %cst_3 = arith.constant 3.200000e+01 : f32
    %10 = vector.broadcast %cst_3 : f32 to vector<16x1xf32>
    %11 = arith.divf %9, %10 : vector<16x1xf32>
    %12 = vector.broadcast %4 : vector<16x1xf32> to vector<16x32xf32>
    %13 = arith.subf %0, %12 : vector<16x32xf32>
    %cst_4 = arith.constant 9.99999996E-13 : f32
    %14 = vector.broadcast %cst_4 : f32 to vector<16x1xf32>
    %15 = arith.addf %11, %14 : vector<16x1xf32>
    %16 = math.rsqrt %15 : vector<16x1xf32>
    %17 = vector.broadcast %16 : vector<16x1xf32> to vector<16x32xf32>
    %18 = arith.mulf %13, %17 : vector<16x32xf32>
    %c0_5 = arith.constant 0 : index
    %c0_6 = arith.constant 0 : index
    %19 = vector.load %arg2[%c0_5, %c0_6] : memref<1x32xf32, #tpu.memory_space<vmem>>, vector<1x32xf32>
    %20 = vector.broadcast %19 : vector<1x32xf32> to vector<16x32xf32>
    %21 = arith.mulf %18, %20 : vector<16x32xf32>
    %c0_7 = arith.constant 0 : index
    %c0_8 = arith.constant 0 : index
    %22 = vector.load %arg3[%c0_7, %c0_8] : memref<1x32xf32, #tpu.memory_space<vmem>>, vector<1x32xf32>
    %23 = vector.broadcast %22 : vector<1x32xf32> to vector<16x32xf32>
    %24 = arith.addf %21, %23 : vector<16x32xf32>
    %25 = arith.truncf %24 : vector<16x32xf32> to vector<16x32xbf16>
    %c0_9 = arith.constant 0 : index
    %c0_10 = arith.constant 0 : index
    %26 = vector.load %arg4[%c0_9, %c0_10] : memref<16x32xbf16, #tpu.memory_space<vmem>>, vector<16x32xbf16>
    tpu.vector_store %arg4[%c0_9, %c0_10], %25 {strides = array<i32>} : memref<16x32xbf16, #tpu.memory_space<vmem>>, vector<16x32xbf16>,
    return
  }
  func.func @transform_0(%arg0: i32) -> (i32, i32) {
    %c0_i32 = arith.constant 0 : i32
    %c0_i32_0 = arith.constant 0 : i32
    return %arg0, %c0_i32 : i32, i32
  }
  func.func @transform_1(%arg0: i32) -> (i32, i32) {
    %c0_i32 = arith.constant 0 : i32
    %c0_i32_0 = arith.constant 0 : i32
    %c0_i32_1 = arith.constant 0 : i32
    return %c0_i32, %c0_i32_0 : i32, i32
  }
  func.func @transform_2(%arg0: i32) -> (i32, i32) {
    %c0_i32 = arith.constant 0 : i32
    %c0_i32_0 = arith.constant 0 : i32
    %c0_i32_1 = arith.constant 0 : i32
    return %c0_i32, %c0_i32_0 : i32, i32
  }
  func.func @transform_3(%arg0: i32) -> (i32, i32) {
    %c0_i32 = arith.constant 0 : i32
    %c0_i32_0 = arith.constant 0 : i32
    return %arg0, %c0_i32 : i32, i32
  }
}

</mosaic_0001>

<bundles_post_ra>
// kernel: tpu_custom_call.1
= control target key start
LH: loop header
LB: loop body
LE: loop exit
PB: predicated region body
PF: predicated region fallthrough
CT: control target
= control target key end

     0   :  { %8 = vsyncpa [#allocation3], 0  ;;  %s207_s0 = inlined_call_operand.hbm [shape: f32[16,32], index: 0, kind: input, shape index: {}]   ;;  %s208_s1 = inlined_call_operand.vmem [shape: f32[1,32], index: 1, kind: input, shape index: {}]   ;;  %s209_s2 = inlined_call_operand.vmem [shape: f32[1,32], index: 2, kind: input, shape index: {}]   ;;  %s210_s3 = inlined_call_operand.hbm [shape: bf16[16,32], index: 3, kind: output, shape index: {}]  }
   0x1   :  { %9 = vsyncpa [#allocation4], 0  ;;  %s165_s12 = smov [#allocation2]  }
   0x2   :  { %s15_s13 = sshll.u32 %s165_s12, 4  ;;  %s16_s13 = int_to_ptr.vmem [resolvable:$true] %s15_s13 }
   0x3   :  { %s129_s14 = scalar_lea.vmem %s16_s13, 256  ;;  %p134_p1 = scmp.lt.s32.totalorder %s16_s13, %s16_s13 }
   0x4   :  { %p130_p0 = scmp.ne.s32.totalorder %s16_s13, %s129_s14  ;;  %p135_p2 = scmp.lt.s32.totalorder %s129_s14, %s129_s14 }
   0x6   :  { %p136_p3 = por %p135_p2, %p134_p1 }
   0x8   :  { %p137_p4 = pnand %p136_p3, %p130_p0 }
   0xa   :  { %140 = shalt.err (!%p137_p4)
}
   0xb   :  { %s166_s15 = smov 128   ;;  %s167_s16 = smov 8  }
   0xc   :  { %21 = dma.hbm_to_vmem [thread:$0]  %s207_s0, 256, %s16_s13, [#allocation3], %s166_s15, %s166_s15, %s167_s16  }
   0xd   :  { %161 = dma.done.wait [#allocation3], 256  }
   0xe   :  { %162 = vsyncadd [#allocation3], 4294967040  ;;  %vm31_vm0 = vcmask 261120   ;;  %v29_v0 = vld [vmem:[#allocation2] sm:$0xff]  ;;  %v30_v1 = vld [vmem:[#allocation2 + $0x8] sm:$0xff]  ;;  %vm85_vm1 = vcmask 257024  }
   0xf   :  { %v32_v2 = vsel %vm31_vm0, %v29_v0, 0.0  ;;  %v35_v3 = vsel %vm31_vm0, %v30_v1, 0.0  ;;  %v105_v21 = vld [vmem:[%s208_s1] ss:$0 sm:$0xff]  ;;  %s168_s22 = smov [#allocation5]  }
  0x10   :  { %33 = vadd.xlane.f32.xlu0 %v32_v2  ;;  %v106_v23 = vld [vmem:[%s209_s2] ss:$0 sm:$0xff]  ;;  %s93_s23 = sshll.u32 %s168_s22, 4  ;;  %s94_s23 = int_to_ptr.vmem [resolvable:$true] %s93_s23 }
  0x11   :  { %s141_s1 = scalar_lea.vmem %s94_s23, 128  ;;  %p146_p6 = scmp.lt.s32.totalorder %s94_s23, %s94_s23 }
  0x12   :  { %p142_p5 = scmp.ne.s32.totalorder %s94_s23, %s141_s1  ;;  %p147_p7 = scmp.lt.s32.totalorder %s141_s1, %s141_s1 }
  0x14   :  { %36 = vadd.xlane.f32.xlu0 %v35_v3  ;;  %p148_p8 = por %p147_p7, %p146_p6 }
  0x16   :  { %p149_p9 = pnand %p148_p8, %p142_p5 }
  0x99   :  { %v34_v4 = vpop.xlane.xlu0 %33 }
  0x9a   :  { %v39_v5 = vmul.f32 0.03125, %v34_v4 }
  0x9c   :  { %v41_v6 = vsub.f32 %v29_v0, %v39_v5 }
  0x9d   :  { %v37_v7 = vpop.xlane.xlu0 %36 }
  0x9e   :  { %v40_v8 = vmul.f32 0.03125, %v37_v7  ;;  %v43_v9 = vmul.f32 %v41_v6, %v41_v6 }
  0xa0   :  { %v42_v10 = vsub.f32 %v30_v1, %v40_v8  ;;  %v45_v11 = vsel %vm31_vm0, %v43_v9, 0.0 }
  0xa1   :  { %46 = vadd.xlane.f32.xlu1 %v45_v11 }
  0xa2   :  { %v44_v12 = vmul.f32 %v42_v10, %v42_v10 }
  0xa4   :  { %v48_v13 = vsel %vm31_vm0, %v44_v12, 0.0 }
  0xa5   :  { %49 = vadd.xlane.f32.xlu1 %v48_v13 }
 0x12a   :  { %v47_v14 = vpop.xlane.xlu1 %46 }
 0x12b   :  { %v51_v15 = vmul.f32 0.03125, %v47_v14 }
 0x12d   :  { %v53_v16 = vadd.f32 1e-12, %v51_v15 }
 0x12e   :  { %v50_v17 = vpop.xlane.xlu1 %49 }
 0x12f   :  { %117 = vrsqrt.f32 %v53_v16  ;;  %v52_v18 = vmul.f32 0.03125, %v50_v17 }
 0x131   :  { %v54_v19 = vadd.f32 1e-12, %v52_v18 }
 0x133   :  { %119 = vrsqrt.f32 %v54_v19 }
 0x13c   :  { %v118_v20 = vpop.eup %117 }
 0x13d   :  { %v57_v22 = vmul.f32 %v118_v20, %v41_v6 }
 0x13f   :  { %v66_v24 = vmul.f32 %v105_v21, %v57_v22 }
 0x140   :  { %v120_v25 = vpop.eup %119 }
 0x141   :  { %v58_v26 = vmul.f32 %v120_v25, %v42_v10  ;;  %v75_v27 = vadd.f32 %v106_v23, %v66_v24 }
 0x143   :  { %v67_v28 = vmul.f32 %v105_v21, %v58_v26  ;;  %v109_v29 = vpack.c.bf16 %v75_v27, %v75_v27 }
 0x145   :  { %v76_v30 = vadd.f32 %v106_v23, %v67_v28  ;;  %86 = vst.msk [vmem:[#allocation5] sm:$0xf] %vm85_vm1, %v109_v29 }
 0x147   :  { %v110_v31 = vpack.c.bf16 %v76_v30, %v76_v30 }
 0x149   :  { %87 = vst.msk [vmem:[#allocation5 + $0x4] sm:$0xf] %vm85_vm1, %v110_v31 }
 0x14a   :  { %152 = shalt.err (!%p149_p9)
}
 0x14b   :  { %s169_s2 = smov 64   ;;  %s170_s24 = smov 4  }
 0x14c   :  { %99 = dma.vmem_to_hbm [thread:$0]  %s94_s23, 128, %s210_s3, [#allocation4], %s169_s2, %s169_s2, %s170_s24  }
 0x14d   :  { %163 = dma.done.wait [#allocation4], 128  }
 0x14e   :  { %164 = vsyncadd [#allocation4], 4294967168 }
 0x14f   :  { %103 = vsyncpa [#allocation3], 1 }
 0x150   :  { %104 = vsyncpa [#allocation4], 1 }

</bundles_post_ra>
